<compile_context>
chip_gen: v6e
topology: v6e:2x2x1
jax: 0.10.0
libtpu: 0.0.40
codegen_flags: <defaults>
</compile_context>

<pallas_src>
import functools
import math

import jax
import jax.numpy as jnp
import numpy as np
from jax.experimental import pallas as pl
from jax.experimental.pallas import tpu as pltpu

HALF_LOG_2PI = 0.5 * math.log(2.0 * math.pi)


# ----------------------------------------------------------------------------- kernel
def actor_critic_kernel(x_ref, eps_ref, a_ref,
                        w0_ref, b0_ref, w1_ref, b1_ref, w2_ref, b2_ref,
                        std_ref, inv_std_ref, const_ref, out_ref,
                        *, act_dim, n_chunks):
    """Fused policy+value towers: 3 bf16 matmuls, 2 tanh per row-chunk, narrow packed store."""
    tb = x_ref.shape[0]
    ch = tb // n_chunks

    # Hoist weight / scalar loads out of the chunk loop.
    w0 = w0_ref[...]
    w1 = w1_ref[...]
    w2 = w2_ref[...]
    b0 = b0_ref[...]
    b1 = b1_ref[...]
    b2 = b2_ref[...]
    std = std_ref[...]                 # (1, ACT)
    inv_std = inv_std_ref[...]         # (1, ACT)
    const_sum = const_ref[0, 0]        # scalar: sum(log_std) + ACT * 0.5*log(2*pi)

    # Independent row-chunks: breaks the serial MXU->tanh->MXU dependency chain so the
    # scheduler can co-issue chunk k+1's matmul with chunk k's tanh / log-prob math.
    for c in range(n_chunks):
        r0, r1 = c * ch, (c + 1) * ch

        x = x_ref[r0:r1, :].astype(jnp.bfloat16)                               # (ch, OBS)
        h = jnp.tanh(jnp.dot(x, w0, preferred_element_type=jnp.float32) + b0)  # (ch, 2H) f32
        h = jnp.tanh(jnp.dot(h.astype(jnp.bfloat16), w1,
                             preferred_element_type=jnp.float32) + b1)          # (ch, 2H) f32
        mu_v = jnp.dot(h.astype(jnp.bfloat16), w2,
                       preferred_element_type=jnp.float32) + b2                 # (ch, ACT+1) f32

        mu = mu_v[:, :act_dim]                       # (ch, ACT)
        v = mu_v[:, act_dim:act_dim + 1]             # (ch, 1)

        eps = eps_ref[r0:r1, :]
        pi = mu + std * eps                          # reparameterized Normal sample

        # Normal log-prob summed over the action dim (no divides; (pi-mu)/std == eps exactly).
        z = (a_ref[r0:r1, :] - mu) * inv_std
        logp = -0.5 * jnp.sum(z * z, axis=-1, keepdims=True) - const_sum
        logp_pi = -0.5 * jnp.sum(eps * eps, axis=-1, keepdims=True) - const_sum

        # Narrow packed output: lanes [0:ACT)=pi, ACT=logp, ACT+1=logp_pi, ACT+2=v.
        # Pad lanes (if any) are never read by the wrapper, so they are not written.
        out_ref[r0:r1, :act_dim] = pi
        out_ref[r0:r1, act_dim:act_dim + 1] = logp
        out_ref[r0:r1, act_dim + 1:act_dim + 2] = logp_pi
        out_ref[r0:r1, act_dim + 2:act_dim + 3] = v


# ----------------------------------------------------------------------------- params
def init_params(key, obs_dim, hidden, act_dim):
    """PyTorch default Linear init ~ U(-1/sqrt(in), 1/sqrt(in)); biases zeroed."""
    sizes_p = [obs_dim] + list(hidden) + [act_dim]
    sizes_v = [obs_dim] + list(hidden) + [1]
    params = {}
    keys = jax.random.split(key, 6)

    def lin(k, fan_in, fan_out):
        bound = 1.0 / math.sqrt(fan_in)
        w = jax.random.uniform(k, (fan_in, fan_out), jnp.float32, -bound, bound)
        b = jnp.zeros((1, fan_out), jnp.float32)
        return w, b

    for i in range(3):
        params[f"p_w{i}"], params[f"p_b{i}"] = lin(keys[i], sizes_p[i], sizes_p[i + 1])
        params[f"v_w{i}"], params[f"v_b{i}"] = lin(keys[3 + i], sizes_v[i], sizes_v[i + 1])
    params["log_std"] = -0.5 * jnp.ones((1, act_dim), jnp.float32)
    return params


def fuse_params(params):
    """Build fused block-diagonal weights ONCE (outside the kernel). Weights -> bf16."""
    p_w0, v_w0 = params["p_w0"], params["v_w0"]
    p_w1, v_w1 = params["p_w1"], params["v_w1"]
    p_w2, v_w2 = params["p_w2"], params["v_w2"]
    H = p_w1.shape[0]
    act_dim = p_w2.shape[1]

    w0 = jnp.concatenate([p_w0, v_w0], axis=1)                          # (OBS, 2H)
    b0 = jnp.concatenate([params["p_b0"], params["v_b0"]], axis=1)      # (1, 2H)

    w1 = jnp.zeros((2 * H, 2 * H), jnp.float32)                         # block-diag (2H, 2H)
    w1 = w1.at[:H, :H].set(p_w1).at[H:, H:].set(v_w1)
    b1 = jnp.concatenate([params["p_b1"], params["v_b1"]], axis=1)      # (1, 2H)

    w2 = jnp.zeros((2 * H, act_dim + 1), jnp.float32)                   # block-diag (2H, ACT+1)
    w2 = w2.at[:H, :act_dim].set(p_w2).at[H:, act_dim:].set(v_w2)
    b2 = jnp.concatenate([params["p_b2"], params["v_b2"]], axis=1)      # (1, ACT+1)

    log_std = params["log_std"]
    const_sum = (jnp.sum(log_std) + act_dim * HALF_LOG_2PI).reshape(1, 1)

    return {
        "w0": w0.astype(jnp.bfloat16), "b0": b0,
        "w1": w1.astype(jnp.bfloat16), "b1": b1,
        "w2": w2.astype(jnp.bfloat16), "b2": b2,
        "std": jnp.exp(log_std),          # (1, ACT) f32
        "inv_std": jnp.exp(-log_std),     # (1, ACT) f32
        "const_sum": const_sum,           # (1, 1)   f32, goes to SMEM
    }


# ----------------------------------------------------------------------------- wrapper
def _choose_tile(B, batch_tile):
    """Batch tile: multiple of 8, <= batch_tile, divides B when possible, >=2 blocks for
    large B (so the 'parallel' axis shards across v7x's two TensorCores)."""
    if B <= 8:
        return 8
    upper = min(batch_tile, B)
    if B >= 16:
        upper = min(upper, -(-B // 2))      # keep at least 2 grid blocks
    upper = max(8, (upper // 8) * 8)
    for tb in range(upper, 7, -8):          # prefer an exact divisor -> no wrapper padding
        if B % tb == 0:
            return tb
    return upper


def mlp_actor_critic_forward(x, eps, a, fused, *, batch_tile=2048):
    B, obs_dim = x.shape
    act_dim = eps.shape[1]
    two_h = fused["w0"].shape[1]
    out_w = ((act_dim + 3 + 7) // 8) * 8    # narrow output: pi|logp|logp_pi|v|(pad to 8)

    tb = _choose_tile(B, batch_tile)
    n_blocks = -(-B // tb)
    b_pad = n_blocks * tb
    if b_pad != B:                          # only for ragged batches with no multiple-of-8 divisor
        pad_rows = b_pad - B
        x = jnp.pad(x, ((0, pad_rows), (0, 0)))
        eps = jnp.pad(eps, ((0, pad_rows), (0, 0)))
        a = jnp.pad(a, ((0, pad_rows), (0, 0)))

    n_chunks = 1
    for cand in (4, 2):                     # chunk rows must stay a multiple of 8
        if tb % (8 * cand) == 0:
            n_chunks = cand
            break

    def batched(width):
        return pl.BlockSpec((tb, width), lambda i: (i, 0))

    def resident(shape):
        return pl.BlockSpec(shape, lambda i: (0, 0))    # stays VMEM-resident across the grid

    in_specs = [
        batched(obs_dim),                      # x
        batched(act_dim),                      # eps
        batched(act_dim),                      # a
        resident((obs_dim, two_h)),            # w0 (bf16)
        resident((1, two_h)),                  # b0
        resident((two_h, two_h)),              # w1 (bf16)
        resident((1, two_h)),                  # b1
        resident((two_h, act_dim + 1)),        # w2 (bf16)
        resident((1, act_dim + 1)),            # b2
        resident((1, act_dim)),                # std
        resident((1, act_dim)),                # inv_std
        pl.BlockSpec(memory_space=pltpu.MemorySpace.SMEM),   # const_sum scalar
    ]
    out_spec = pl.BlockSpec((tb, out_w), lambda i: (i, 0))

    # VMEM budget: (bf16 weights + f32 biases/scalars) + double-buffered batch tiles,
    # 2x each for Pallas's own double-buffering, capped well below v7x's 64 MiB physical.
    weight_bytes = 2 * (obs_dim * two_h + two_h * two_h + two_h * (act_dim + 1)) \
        + 4 * (2 * two_h + (act_dim + 1) + 2 * act_dim)
    tile_bytes = 4 * tb * (obs_dim + 2 * act_dim + out_w)
    vmem_limit = int(min(32 << 20, max(2 << 20, 2 * (2 * weight_bytes + 2 * tile_bytes))))

    kernel = functools.partial(actor_critic_kernel, act_dim=act_dim, n_chunks=n_chunks)

    out = pl.pallas_call(
        kernel,
        out_shape=jax.ShapeDtypeStruct((b_pad, out_w), jnp.float32),
        grid_spec=pltpu.PrefetchScalarGridSpec(
            num_scalar_prefetch=0,
            grid=(n_blocks,),
            in_specs=in_specs,
            out_specs=out_spec,
        ),
        compiler_params=pltpu.CompilerParams(
            dimension_semantics=("parallel",),
            vmem_limit_bytes=vmem_limit,
        ),
    )(x, eps, a, fused["w0"], fused["b0"], fused["w1"], fused["b1"],
      fused["w2"], fused["b2"], fused["std"], fused["inv_std"], fused["const_sum"])

    pi = out[:B, :act_dim]
    logp = out[:B, act_dim]
    logp_pi = out[:B, act_dim + 1]
    v = out[:B, act_dim + 2]
    return pi, logp, logp_pi, v


# ----------------------------------------------------------------------------- reference
def reference_forward(x, eps, a, params):
    """Pure-JAX f32 reference (unfused) for correctness checking."""
    def mlp(x, prefix):
        h = jnp.tanh(x @ params[f"{prefix}_w0"] + params[f"{prefix}_b0"])
        h = jnp.tanh(h @ params[f"{prefix}_w1"] + params[f"{prefix}_b1"])
        return h @ params[f"{prefix}_w2"] + params[f"{prefix}_b2"]

    mu = mlp(x, "p")
    log_std = params["log_std"]
    std = jnp.exp(log_std)
    pi = mu + std * eps

    def lp(val):
        z = (val - mu) / std
        return jnp.sum(-0.5 * z * z - log_std - HALF_LOG_2PI, axis=-1)

    v = mlp(x, "v")[:, 0]
    return pi, lp(a), lp(pi), v


def _check(outs, refs, tol):
    for got, want in zip(outs, refs):
        np.testing.assert_allclose(np.asarray(got), np.asarray(want), rtol=tol, atol=tol)


if __name__ == "__main__":
    OBS, H, ACT = 16, 32, 4
    key = jax.random.PRNGKey(0)
    k_x, k_eps, k_a, k_param = jax.random.split(key, 4)
    params = init_params(k_param, OBS, (H, H), ACT)
    fused = fuse_params(params)                              # built once, outside the kernel

    # bf16 MXU operands -> relaxed tolerance vs. the f32 reference (per perf review).
    TOL = 5e-2

    # Small single-block case.
    B = 8
    x = jax.random.normal(k_x, (B, OBS), jnp.float32)
    eps = jax.random.normal(k_eps, (B, ACT), jnp.float32)    # standard-normal sample noise
    a = jax.random.normal(k_a, (B, ACT), jnp.float32)        # actions for logp
    outs = mlp_actor_critic_forward(x, eps, a, fused)
    jax.block_until_ready(outs)
    _check(outs, reference_forward(x, eps, a, params), TOL)

    # Multi-block, multi-chunk case (exercises grid sharding + in-kernel chunk interleave).
    B2 = 64
    x2 = jax.random.normal(k_x, (B2, OBS), jnp.float32)
    eps2 = jax.random.normal(k_eps, (B2, ACT), jnp.float32)
    a2 = jax.random.normal(k_a, (B2, ACT), jnp.float32)
    outs2 = mlp_actor_critic_forward(x2, eps2, a2, fused)
    jax.block_until_ready(outs2)
    _check(outs2, reference_forward(x2, eps2, a2, params), TOL)

    print("KERNEL_OK")
</pallas_src>

<mosaic_0001>
module attributes {stable_mosaic.version = 11 : i64} {
  func.func @actor_critic_kernel(%arg0: i32, %arg1: memref<8x16xf32, #tpu.memory_space<vmem>>, %arg2: memref<8x4xf32, #tpu.memory_space<vmem>>, %arg3: memref<8x4xf32, #tpu.memory_space<vmem>>, %arg4: memref<16x64xbf16, #tpu.memory_space<vmem>>, %arg5: memref<1x64xf32, #tpu.memory_space<vmem>>, %arg6: memref<64x64xbf16, #tpu.memory_space<vmem>>, %arg7: memref<1x64xf32, #tpu.memory_space<vmem>>, %arg8: memref<64x5xbf16, #tpu.memory_space<vmem>>, %arg9: memref<1x5xf32, #tpu.memory_space<vmem>>, %arg10: memref<1x4xf32, #tpu.memory_space<vmem>>, %arg11: memref<1x4xf32, #tpu.memory_space<vmem>>, %arg12: memref<1x1xf32, #tpu.memory_space<smem>>, %arg13: memref<8x8xf32, #tpu.memory_space<vmem>>) attributes {dimension_semantics = [#tpu.dimension_semantics<parallel>], iteration_bounds = array<i64: 1>, scalar_prefetch = 0 : i64, scratch_operands = 0 : i64, tpu.core_type = #tpu.core_type<tc>, window_params = [{transform_indices = @transform_0, window_bounds = array<i64: 8, 16>}, {transform_indices = @transform_1, window_bounds = array<i64: 8, 4>}, {transform_indices = @transform_2, window_bounds = array<i64: 8, 4>}, {pipeline_mode = #tpu.pipeline_mode<synchronous>, transform_indices = @transform_3, window_bounds = array<i64: 16, 64>}, {pipeline_mode = #tpu.pipeline_mode<synchronous>, transform_indices = @transform_4, window_bounds = array<i64: 1, 64>}, {pipeline_mode = #tpu.pipeline_mode<synchronous>, transform_indices = @transform_5, window_bounds = array<i64: 64, 64>}, {pipeline_mode = #tpu.pipeline_mode<synchronous>, transform_indices = @transform_6, window_bounds = array<i64: 1, 64>}, {pipeline_mode = #tpu.pipeline_mode<synchronous>, transform_indices = @transform_7, window_bounds = array<i64: 64, 5>}, {pipeline_mode = #tpu.pipeline_mode<synchronous>, transform_indices = @transform_8, window_bounds = array<i64: 1, 5>}, {pipeline_mode = #tpu.pipeline_mode<synchronous>, transform_indices = @transform_9, window_bounds = array<i64: 1, 4>}, {pipeline_mode = #tpu.pipeline_mode<synchronous>, transform_indices = @transform_10, window_bounds = array<i64: 1, 4>}, {transform_indices = @transform_11, window_bounds = array<i64: 1, 1>}, {transform_indices = @transform_12, window_bounds = array<i64: 8, 8>}]} {
    %c0 = arith.constant 0 : index
    %c0_0 = arith.constant 0 : index
    %0 = vector.load %arg4[%c0, %c0_0] : memref<16x64xbf16, #tpu.memory_space<vmem>>, vector<16x64xbf16>
    %c0_1 = arith.constant 0 : index
    %c0_2 = arith.constant 0 : index
    %1 = vector.load %arg6[%c0_1, %c0_2] : memref<64x64xbf16, #tpu.memory_space<vmem>>, vector<64x64xbf16>
    %c0_3 = arith.constant 0 : index
    %c0_4 = arith.constant 0 : index
    %2 = vector.load %arg8[%c0_3, %c0_4] : memref<64x5xbf16, #tpu.memory_space<vmem>>, vector<64x5xbf16>
    %c0_5 = arith.constant 0 : index
    %c0_6 = arith.constant 0 : index
    %3 = vector.load %arg5[%c0_5, %c0_6] : memref<1x64xf32, #tpu.memory_space<vmem>>, vector<1x64xf32>
    %c0_7 = arith.constant 0 : index
    %c0_8 = arith.constant 0 : index
    %4 = vector.load %arg7[%c0_7, %c0_8] : memref<1x64xf32, #tpu.memory_space<vmem>>, vector<1x64xf32>
    %c0_9 = arith.constant 0 : index
    %c0_10 = arith.constant 0 : index
    %5 = vector.load %arg9[%c0_9, %c0_10] : memref<1x5xf32, #tpu.memory_space<vmem>>, vector<1x5xf32>
    %c0_11 = arith.constant 0 : index
    %c0_12 = arith.constant 0 : index
    %6 = vector.load %arg10[%c0_11, %c0_12] : memref<1x4xf32, #tpu.memory_space<vmem>>, vector<1x4xf32>
    %c0_13 = arith.constant 0 : index
    %c0_14 = arith.constant 0 : index
    %7 = vector.load %arg11[%c0_13, %c0_14] : memref<1x4xf32, #tpu.memory_space<vmem>>, vector<1x4xf32>
    %c0_15 = arith.constant 0 : index
    %c0_16 = arith.constant 0 : index
    %8 = memref.load %arg12[%c0_15, %c0_16] : memref<1x1xf32, #tpu.memory_space<smem>>
    %c0_17 = arith.constant 0 : index
    %c0_18 = arith.constant 0 : index
    %9 = vector.load %arg1[%c0_17, %c0_18] : memref<8x16xf32, #tpu.memory_space<vmem>>, vector<8x16xf32>
    %10 = arith.truncf %9 : vector<8x16xf32> to vector<8x16xbf16>
    %cst = arith.constant dense<0.000000e+00> : vector<8x64xf32>
    %11 = tpu.matmul %10, %0, %cst {dimension_numbers = #tpu.dot_dimension_numbers<[1], [0], [0], [1], [0, 0, 1, 1], [], []>} : vector<8x16xbf16>, vector<16x64xbf16>, vector<8x64xf32> -> vector<8x64xf32>
    %12 = vector.broadcast %3 : vector<1x64xf32> to vector<8x64xf32>
    %13 = arith.addf %11, %12 : vector<8x64xf32>
    %14 = math.tanh %13 : vector<8x64xf32>
    %15 = arith.truncf %14 : vector<8x64xf32> to vector<8x64xbf16>
    %cst_19 = arith.constant dense<0.000000e+00> : vector<8x64xf32>
    %16 = tpu.matmul %15, %1, %cst_19 {dimension_numbers = #tpu.dot_dimension_numbers<[1], [0], [0], [1], [0, 0, 1, 1], [], []>} : vector<8x64xbf16>, vector<64x64xbf16>, vector<8x64xf32> -> vector<8x64xf32>
    %17 = vector.broadcast %4 : vector<1x64xf32> to vector<8x64xf32>
    %18 = arith.addf %16, %17 : vector<8x64xf32>
    %19 = math.tanh %18 : vector<8x64xf32>
    %20 = arith.truncf %19 : vector<8x64xf32> to vector<8x64xbf16>
    %cst_20 = arith.constant dense<0.000000e+00> : vector<8x5xf32>
    %21 = tpu.matmul %20, %2, %cst_20 {dimension_numbers = #tpu.dot_dimension_numbers<[1], [0], [0], [1], [0, 0, 1, 1], [], []>} : vector<8x64xbf16>, vector<64x5xbf16>, vector<8x5xf32> -> vector<8x5xf32>
    %22 = vector.broadcast %5 : vector<1x5xf32> to vector<8x5xf32>
    %23 = arith.addf %21, %22 : vector<8x5xf32>
    %24 = vector.extract_strided_slice %23 {offsets = [0, 0], sizes = [8, 4], strides = [1, 1]} : vector<8x5xf32> to vector<8x4xf32>
    %25 = vector.extract_strided_slice %23 {offsets = [0, 4], sizes = [8, 1], strides = [1, 1]} : vector<8x5xf32> to vector<8x1xf32>
    %c0_21 = arith.constant 0 : index
    %c0_22 = arith.constant 0 : index
    %26 = vector.load %arg2[%c0_21, %c0_22] : memref<8x4xf32, #tpu.memory_space<vmem>>, vector<8x4xf32>
    %27 = vector.broadcast %6 : vector<1x4xf32> to vector<8x4xf32>
    %28 = arith.mulf %27, %26 : vector<8x4xf32>
    %29 = arith.addf %24, %28 : vector<8x4xf32>
    %c0_23 = arith.constant 0 : index
    %c0_24 = arith.constant 0 : index
    %30 = vector.load %arg3[%c0_23, %c0_24] : memref<8x4xf32, #tpu.memory_space<vmem>>, vector<8x4xf32>
    %31 = arith.subf %30, %24 : vector<8x4xf32>
    %32 = vector.broadcast %7 : vector<1x4xf32> to vector<8x4xf32>
    %33 = arith.mulf %31, %32 : vector<8x4xf32>
    %34 = arith.mulf %33, %33 : vector<8x4xf32>
    %cst_25 = arith.constant dense<0.000000e+00> : vector<8xf32>
    %35 = vector.multi_reduction <add>, %34, %cst_25 [1] : vector<8x4xf32> to vector<8xf32>
    %36 = vector.shape_cast %35 : vector<8xf32> to vector<8x1xf32>
    %cst_26 = arith.constant -5.000000e-01 : f32
    %37 = vector.broadcast %cst_26 : f32 to vector<8x1xf32>
    %38 = arith.mulf %37, %36 : vector<8x1xf32>
    %39 = vector.broadcast %8 : f32 to vector<8x1xf32>
    %40 = arith.subf %38, %39 : vector<8x1xf32>
    %41 = arith.mulf %26, %26 : vector<8x4xf32>
    %cst_27 = arith.constant dense<0.000000e+00> : vector<8xf32>
    %42 = vector.multi_reduction <add>, %41, %cst_27 [1] : vector<8x4xf32> to vector<8xf32>
    %43 = vector.shape_cast %42 : vector<8xf32> to vector<8x1xf32>
    %cst_28 = arith.constant -5.000000e-01 : f32
    %44 = vector.broadcast %cst_28 : f32 to vector<8x1xf32>
    %45 = arith.mulf %44, %43 : vector<8x1xf32>
    %46 = vector.broadcast %8 : f32 to vector<8x1xf32>
    %47 = arith.subf %45, %46 : vector<8x1xf32>
    %c0_29 = arith.constant 0 : index
    %c0_30 = arith.constant 0 : index
    %48 = vector.load %arg13[%c0_29, %c0_30] : memref<8x8xf32, #tpu.memory_space<vmem>>, vector<8x4xf32>
    tpu.vector_store %arg13[%c0_29, %c0_30], %29 {strides = array<i32>} : memref<8x8xf32, #tpu.memory_space<vmem>>, vector<8x4xf32>,
    %c0_31 = arith.constant 0 : index
    %c4 = arith.constant 4 : index
    %49 = vector.load %arg13[%c0_31, %c4] : memref<8x8xf32, #tpu.memory_space<vmem>>, vector<8x1xf32>
    tpu.vector_store %arg13[%c0_31, %c4], %40 {strides = array<i32>} : memref<8x8xf32, #tpu.memory_space<vmem>>, vector<8x1xf32>,
    %c0_32 = arith.constant 0 : index
    %c5 = arith.constant 5 : index
    %50 = vector.load %arg13[%c0_32, %c5] : memref<8x8xf32, #tpu.memory_space<vmem>>, vector<8x1xf32>
    tpu.vector_store %arg13[%c0_32, %c5], %47 {strides = array<i32>} : memref<8x8xf32, #tpu.memory_space<vmem>>, vector<8x1xf32>,
    %c0_33 = arith.constant 0 : index
    %c6 = arith.constant 6 : index
    %51 = vector.load %arg13[%c0_33, %c6] : memref<8x8xf32, #tpu.memory_space<vmem>>, vector<8x1xf32>
    tpu.vector_store %arg13[%c0_33, %c6], %25 {strides = array<i32>} : memref<8x8xf32, #tpu.memory_space<vmem>>, vector<8x1xf32>,
    return
  }
  func.func @transform_0(%arg0: i32) -> (i32, i32) {
    %c0_i32 = arith.constant 0 : i32
    %c0_i32_0 = arith.constant 0 : i32
    return %arg0, %c0_i32 : i32, i32
  }
  func.func @transform_1(%arg0: i32) -> (i32, i32) {
    %c0_i32 = arith.constant 0 : i32
    %c0_i32_0 = arith.constant 0 : i32
    return %arg0, %c0_i32 : i32, i32
  }
  func.func @transform_2(%arg0: i32) -> (i32, i32) {
    %c0_i32 = arith.constant 0 : i32
    %c0_i32_0 = arith.constant 0 : i32
    return %arg0, %c0_i32 : i32, i32
  }
  func.func @transform_3(%arg0: i32) -> (i32, i32) {
    %c0_i32 = arith.constant 0 : i32
    %c0_i32_0 = arith.constant 0 : i32
    %c0_i32_1 = arith.constant 0 : i32
    return %c0_i32, %c0_i32_0 : i32, i32
  }
  func.func @transform_4(%arg0: i32) -> (i32, i32) {
    %c0_i32 = arith.constant 0 : i32
    %c0_i32_0 = arith.constant 0 : i32
    %c0_i32_1 = arith.constant 0 : i32
    return %c0_i32, %c0_i32_0 : i32, i32
  }
  func.func @transform_5(%arg0: i32) -> (i32, i32) {
    %c0_i32 = arith.constant 0 : i32
    %c0_i32_0 = arith.constant 0 : i32
    %c0_i32_1 = arith.constant 0 : i32
    return %c0_i32, %c0_i32_0 : i32, i32
  }
  func.func @transform_6(%arg0: i32) -> (i32, i32) {
    %c0_i32 = arith.constant 0 : i32
    %c0_i32_0 = arith.constant 0 : i32
    %c0_i32_1 = arith.constant 0 : i32
    return %c0_i32, %c0_i32_0 : i32, i32
  }
  func.func @transform_7(%arg0: i32) -> (i32, i32) {
    %c0_i32 = arith.constant 0 : i32
    %c0_i32_0 = arith.constant 0 : i32
    %c0_i32_1 = arith.constant 0 : i32
    return %c0_i32, %c0_i32_0 : i32, i32
  }
  func.func @transform_8(%arg0: i32) -> (i32, i32) {
    %c0_i32 = arith.constant 0 : i32
    %c0_i32_0 = arith.constant 0 : i32
    %c0_i32_1 = arith.constant 0 : i32
    return %c0_i32, %c0_i32_0 : i32, i32
  }
  func.func @transform_9(%arg0: i32) -> (i32, i32) {
    %c0_i32 = arith.constant 0 : i32
    %c0_i32_0 = arith.constant 0 : i32
    %c0_i32_1 = arith.constant 0 : i32
    return %c0_i32, %c0_i32_0 : i32, i32
  }
  func.func @transform_10(%arg0: i32) -> (i32, i32) {
    %c0_i32 = arith.constant 0 : i32
    %c0_i32_0 = arith.constant 0 : i32
    %c0_i32_1 = arith.constant 0 : i32
    return %c0_i32, %c0_i32_0 : i32, i32
  }
  func.func @transform_11(%arg0: i32) -> (i32, i32) {
    %c0_i32 = arith.constant 0 : i32
    %c0_i32_0 = arith.constant 0 : i32
    %c0_i32_1 = arith.constant 0 : i32
    return %c0_i32, %c0_i32_0 : i32, i32
  }
  func.func @transform_12(%arg0: i32) -> (i32, i32) {
    %c0_i32 = arith.constant 0 : i32
    %c0_i32_0 = arith.constant 0 : i32
    return %arg0, %c0_i32 : i32, i32
  }
}

</mosaic_0001>

<bundles_post_ra>
// kernel: tpu_custom_call.1
= control target key start
LH: loop header
LB: loop body
LE: loop exit
PB: predicated region body
PF: predicated region fallthrough
CT: control target
= control target key end

     0   :  { %v432_v1 = vmov 0.0   ;;  %vm82_vm0 = vcmask 130048   ;;  %vm433_vm1 = vmmov 0   ;;  %s560_s0 = inlined_call_operand.vmem [shape: f32[8,16], index: 0, kind: input, shape index: {}]   ;;  %s561_s1 = inlined_call_operand.vmem [shape: f32[8,4], index: 1, kind: input, shape index: {}]   ;;  %s562_s2 = inlined_call_operand.vmem [shape: f32[8,4], index: 2, kind: input, shape index: {}]   ;;  %s563_s3 = inlined_call_operand.vmem [shape: bf16[16,64], index: 3, kind: input, shape index: {}]   ;;  %s564_s4 = inlined_call_operand.vmem [shape: f32[1,64], index: 4, kind: input, shape index: {}]   ;;  %s565_s5 = inlined_call_operand.vmem [shape: bf16[64,64], index: 5, kind: input, shape index: {}]   ;;  %s566_s6 = inlined_call_operand.vmem [shape: f32[1,64], index: 6, kind: input, shape index: {}]   ;;  %s567_s7 = inlined_call_operand.vmem [shape: bf16[64,5], index: 7, kind: input, shape index: {}]   ;;  %s568_s8 = inlined_call_operand.vmem [shape: f32[1,5], index: 8, kind: input, shape index: {}]   ;;  %s569_s9 = inlined_call_operand.vmem [shape: f32[1,4], index: 9, kind: input, shape index: {}]   ;;  %s570_s10 = inlined_call_operand.vmem [shape: f32[1,4], index: 10, kind: input, shape index: {}]   ;;  %s571_s11 = inlined_call_operand.<no memory space> [shape: f32[1,1], index: 11, kind: input, shape index: {}]   ;;  %s572_s12 = inlined_call_operand.hbm [shape: f32[8,8], index: 12, kind: output, shape index: {}]  }
   0x1   :  { %v397_v0 = vld [vmem:[%s563_s3] sm:$0xff]   ;;  %363 = vmatprep.subr.bf16.mxu0 %v432_v1  ;;  %369 = vmatprep.subr.bf16.mxu1 %v432_v1 }
   0x2   :  { %v68_v2 = vld [vmem:[%s560_s0] sm:$0xff]  ;;  %364 = vmatpush3.bf16.msra.mxu0 %v397_v0  ;;  %365 = vmatprep.mubr.msk.bf16.mxu0 %vm433_vm1, %v432_v1 }
   0x3   :  { %v69_v3 = vpack.c.bf16 %v68_v2, %v68_v2  ;;  %377 = vmatprep.mubr.msk.bf16.mxu1 %vm433_vm1, %v432_v1  ;;  %381 = vmatprep.subr.bf16.mxu0 %v432_v1 }
   0x5   :  { %366 = vmatmul.mubr.msk.bf16.vlgmr.msra.gmra.mxu0 %vm82_vm0, %v69_v3 }
   0x6   :  { %389 = vmatprep.mubr.msk.bf16.mxu0 %vm433_vm1, %v432_v1 }
   0x7   :  { %18 = vsyncpa [#allocation4], 0  ;;  %v398_v4 = vld [vmem:[%s565_s5 + $0x18] sm:$0xff]   ;;  %v399_v5 = vld [vmem:[%s565_s5 + $0x10] sm:$0xff]   ;;  %vm158_vm2 = vcmask 523264   ;;  %vm296_vm3 = vcmask 31744   ;;  %v301_v46 = vstv %s571_s11 }
   0x8   :  { %370 = vmatpush3.bf16.msra.mxu1 %v398_v4  ;;  %v400_v6 = vld [vmem:[%s565_s5 + $0x8] sm:$0xff]   ;;  %v401_v7 = vld [vmem:[%s565_s5] sm:$0xff]   ;;  %v402_v16 = vld [vmem:[%s567_s7 + $0x18] sm:$0xff]   ;;  %vm310_vm4 = vcmask 39968   ;;  %vm312_vm5 = vcmask 48168   ;;  %vm318_vm6 = vcmask 56368  }
   0x9   :  { %371 = vmatprep.subr.bf16.mxu1 %v432_v1  ;;  %v334_v8 = vld [vmem:[%s564_s4] ss:$0 sm:$0xff]  ;;  %382 = vmatpush3.bf16.msra.mxu0 %v402_v16  ;;  %v403_v17 = vld [vmem:[%s567_s7 + $0x10] sm:$0xff]   ;;  %v404_v18 = vld [vmem:[%s567_s7 + $0x8] sm:$0xff]  }
   0xa   :  { %383 = vmatprep.subr.bf16.mxu0 %v432_v1  ;;  %v405_v19 = vld [vmem:[%s567_s7] sm:$0xff]  }
   0xb   :  { %v337_v20 = vld [vmem:[%s566_s6] ss:$0 sm:$0xff] }
   0xc   :  { %372 = vmatpush3.bf16.msra.mxu1 %v399_v5  ;;  %v349_v28 = vld [vmem:[%s569_s9] ss:$0 sm:$0xff]  ;;  %s434_s9 = smov 2  }
   0xd   :  { %373 = vmatprep.subr.bf16.mxu1 %v432_v1  ;;  %384 = vmatpush3.bf16.msra.mxu0 %v403_v17  ;;  %v277_v29 = vld [vmem:[%s561_s1] sm:$0xff] }
   0xe   :  { %385 = vmatprep.subr.bf16.mxu0 %v432_v1  ;;  %v343_v30 = vld [vmem:[%s568_s8] ss:$0 sm:$0xff]  ;;  %v284_v31 = vmul.f32 %v349_v28, %v277_v29  ;;  %v303_v43 = vmul.f32 %v277_v29, %v277_v29  ;;  %s435_s8 = smov [#allocation3]  }
   0xf   :  { %v286_v33 = vld [vmem:[%s562_s2] sm:$0xff] }
  0x10   :  { %374 = vmatpush3.bf16.msra.mxu1 %v400_v6  ;;  %v350_v36 = vld [vmem:[%s570_s10] ss:$0 sm:$0xff]  ;;  %v304_v45 = vsel %vm296_vm3, %v303_v43, 0.0  ;;  %s326_s10 = sshll.u32 %s435_s8, 4  ;;  %s327_s10 = int_to_ptr.vmem [resolvable:$true] %s326_s10 }
  0x11   :  { %375 = vmatprep.subr.bf16.mxu1 %v432_v1  ;;  %386 = vmatpush3.bf16.msra.mxu0 %v404_v18  ;;  %s410_s29 = scalar_lea.vmem %s327_s10, 128  ;;  %p415_p1 = scmp.lt.s32.totalorder %s327_s10, %s327_s10 }
  0x12   :  { %387 = vmatprep.subr.bf16.mxu0 %v432_v1  ;;  %p411_p0 = scmp.ne.s32.totalorder %s327_s10, %s410_s29  ;;  %p416_p2 = scmp.lt.s32.totalorder %s410_s29, %s410_s29 }
  0x14   :  { %376 = vmatpush3.bf16.msra.mxu1 %v401_v7  ;;  %p417_p3 = por %p416_p2, %p415_p1 }
  0x15   :  { %388 = vmatpush3.bf16.msra.mxu0 %v405_v19 }
  0x16   :  { %p418_p4 = pnand %p417_p3, %p411_p0 }
  0xc5   :  { %v120_v9 = vpop.f32.mrf.mxu0 }
  0xc6   :  { %v121_v10 = vadd.f32 %v334_v8, %v120_v9 }
  0xc7   :  { %v367_v11 = vpop.f32.mrf.mxu0 }
  0xc8   :  { %406 = vtanh.f32 %v121_v10 }
  0xc9   :  { %v123_v12 = vpop.f32.mrf.mxu0 }
  0xcb   :  { %v368_v13 = vpop.f32.mrf.mxu0 }
  0xd5   :  { %v407_v14 = vpop.eup %406 }
  0xd6   :  { %v127_v15 = vpack.c.bf16 %v407_v14, %v407_v14 }
  0xd8   :  { %378 = vmatmul.mubr.msk.bf16.vlgmr.msra.gmra.mxu1 %vm158_vm2, %v127_v15 }
 0x198   :  { %v196_v21 = vpop.f32.mrf.mxu1 }
 0x199   :  { %v197_v22 = vadd.f32 %v337_v20, %v196_v21 }
 0x19a   :  { %v379_v23 = vpop.f32.mrf.mxu1 }
 0x19b   :  { %408 = vtanh.f32 %v197_v22 }
 0x19c   :  { %v199_v24 = vpop.f32.mrf.mxu1 }
 0x19e   :  { %v380_v25 = vpop.f32.mrf.mxu1 }
 0x1a8   :  { %v409_v26 = vpop.eup %408 }
 0x1a9   :  { %v203_v27 = vpack.c.bf16 %v409_v26, %v409_v26 }
 0x1ab   :  { %390 = vmatmul.mubr.msk.bf16.vlgmr.msra.gmra.mxu0 %vm158_vm2, %v203_v27 }
 0x26b   :  { %v271_v32 = vpop.f32.mrf.mxu0 }
 0x26c   :  { %v272_v34 = vadd.f32 %v343_v30, %v271_v32 }
 0x26d   :  { %v391_v35 = vpop.f32.mrf.mxu0 }
 0x26e   :  { %315 = vrot.lane.b32.xlu1 %v272_v34, %s434_s9  ;;  %v287_v37 = vsub.f32 %v286_v33, %v272_v34  ;;  %v285_v38 = vadd.f32 %v284_v31, %v272_v34 }
 0x26f   :  { %v274_v39 = vpop.f32.mrf.mxu0 }
 0x270   :  { %v294_v40 = vmul.f32 %v350_v36, %v287_v37  ;;  %309 = vst.msk [vmem:[#allocation3] sm:$0xff] %vm296_vm3, %v285_v38 }
 0x271   :  { %v392_v41 = vpop.f32.mrf.mxu0 }
 0x272   :  { %v295_v42 = vmul.f32 %v294_v40, %v294_v40 }
 0x274   :  { %v297_v44 = vsel %vm296_vm3, %v295_v42, 0.0 }
 0x275   :  { %298 = vadd.xlane.f32.xlu0 %v297_v44 }
 0x279   :  { %305 = vadd.xlane.f32.xlu0 %v304_v45 }
 0x2e0   :  { %v316_v53 = vpop.permute.xlu1 %315 }
 0x2fe   :  { %v299_v47 = vpop.xlane.xlu0 %298 }
 0x2ff   :  { %v300_v48 = vmul.f32 -0.5, %v299_v47 }
 0x301   :  { %v302_v49 = vsub.f32 %v300_v48, %v301_v46 }
 0x302   :  { %v306_v50 = vpop.xlane.xlu0 %305 }
 0x303   :  { %v307_v51 = vmul.f32 -0.5, %v306_v50  ;;  %311 = vst.msk [vmem:[#allocation3] sm:$0xff] %vm310_vm4, %v302_v49 }
 0x305   :  { %v308_v52 = vsub.f32 %v307_v51, %v301_v46 }
 0x307   :  { %313 = vst.msk [vmem:[#allocation3] sm:$0xff] %vm312_vm5, %v308_v52 }
 0x308   :  { %319 = vst.msk [vmem:[#allocation3] sm:$0xff] %vm318_vm6, %v316_v53 }
 0x309   :  { %421 = shalt.err (!%p418_p4)
}
 0x30a   :  { %329 = dma.vmem_to_hbm [thread:$0]  %s327_s10, 128, %s572_s12, [#allocation4]  }
 0x30b   :  { %430 = dma.done.wait [#allocation4], 128  }
 0x30c   :  { %431 = vsyncadd [#allocation4], 4294967168 }
 0x30d   :  { %333 = vsyncpa [#allocation4], 1 }

</bundles_post_ra>
